<compile_context>
chip_gen: v5e
topology: v5e:2x2
jax: 0.10.0
libtpu: 0.0.40
codegen_flags: <defaults>
</compile_context>

<pallas_src>
import functools

import jax
import jax.numpy as jnp
from jax.experimental import pallas as pl
from jax.experimental.pallas import tpu as pltpu


# ---------------------------------------------------------------------------
# helpers
# ---------------------------------------------------------------------------
def _round_up(x, m):
    return ((x + m - 1) // m) * m


def _pick_tile(n, candidates):
    for c in candidates:
        if n % c == 0:
            return c
    return n  # n is always padded to a multiple of 128, so this is unreachable


def _pad2d(a, rows, cols):
    return jnp.pad(a, ((0, rows - a.shape[0]), (0, cols - a.shape[1])))


# ---------------------------------------------------------------------------
# Kernel 1: feature transform  XW = X @ W   (row-tiled, pipelined)
# ---------------------------------------------------------------------------
def _xw_kernel(x_ref, w_ref, o_ref):
    o_ref[...] = jnp.dot(
        x_ref[...], w_ref[...], preferred_element_type=jnp.float32
    ).astype(o_ref.dtype)


def feature_transform(x, w, *, out_dtype):
    n, f_in = x.shape
    f_out = w.shape[1]
    tm = _pick_tile(n, (512, 256, 128))
    grid = (n // tm,)

    return pl.pallas_call(
        _xw_kernel,
        out_shape=jax.ShapeDtypeStruct((n, f_out), out_dtype),
        grid=grid,
        in_specs=[
            pl.BlockSpec((tm, f_in), lambda i: (i, 0)),     # X row tile
            pl.BlockSpec((f_in, f_out), lambda i: (0, 0)),  # W (small, resident)
        ],
        out_specs=pl.BlockSpec((tm, f_out), lambda i: (i, 0)),
        compiler_params=pltpu.CompilerParams(
            dimension_semantics=("parallel",),
            vmem_limit_bytes=32 * 1024 * 1024,
        ),
        cost_estimate=pl.CostEstimate(
            flops=2 * n * f_in * f_out,
            transcendentals=0,
            bytes_accessed=(n * f_in + f_in * f_out) * x.dtype.itemsize
            + n * f_out * jnp.dtype(out_dtype).itemsize,
        ),
    )(x, w)


# ---------------------------------------------------------------------------
# Kernel 2: aggregation  out = act(A_hat @ XW + b)
#   grid = (row tiles, K tiles) with f32 VMEM accumulator (pattern P1 + P3)
# ---------------------------------------------------------------------------
def _agg_kernel(a_ref, xw_ref, b_ref, o_ref, acc_ref, *, apply_relu: bool):
    k = pl.program_id(1)

    @pl.when(k == 0)
    def _init():
        acc_ref[...] = jnp.zeros_like(acc_ref)

    acc_ref[...] += jnp.dot(
        a_ref[...], xw_ref[...], preferred_element_type=jnp.float32
    )

    @pl.when(k == pl.num_programs(1) - 1)
    def _finalize():
        out = acc_ref[...] + b_ref[...].astype(jnp.float32)
        if apply_relu:
            out = jnp.maximum(out, 0.0)
        o_ref[...] = out.astype(o_ref.dtype)


def aggregate(a_hat, xw, b, *, apply_relu: bool, out_dtype):
    n = a_hat.shape[0]
    f = xw.shape[1]
    tm = _pick_tile(n, (256, 128))            # output row tile (MXU-friendly)
    tk = _pick_tile(n, (512, 256, 128))       # streamed reduction tile of A_hat
    grid = (n // tm, n // tk)

    kernel = functools.partial(_agg_kernel, apply_relu=apply_relu)

    return pl.pallas_call(
        kernel,
        out_shape=jax.ShapeDtypeStruct((n, f), out_dtype),
        grid=grid,
        in_specs=[
            pl.BlockSpec((tm, tk), lambda i, k: (i, k)),   # A_hat tile (HBM stream)
            pl.BlockSpec((tk, f), lambda i, k: (k, 0)),    # precomputed XW tile
            pl.BlockSpec((1, f), lambda i, k: (0, 0)),     # bias (lane-dense)
        ],
        out_specs=pl.BlockSpec((tm, f), lambda i, k: (i, 0)),
        scratch_shapes=[pltpu.VMEM((tm, f), jnp.float32)],
        compiler_params=pltpu.CompilerParams(
            dimension_semantics=("parallel", "arbitrary"),
            vmem_limit_bytes=32 * 1024 * 1024,
        ),
        cost_estimate=pl.CostEstimate(
            flops=2 * n * n * f,
            transcendentals=0,
            bytes_accessed=n * n * a_hat.dtype.itemsize
            + n * f * xw.dtype.itemsize
            + n * f * jnp.dtype(out_dtype).itemsize,
        ),
    )(a_hat, xw, b)


# ---------------------------------------------------------------------------
# Glue: normalized adjacency, parameter init, full forward
# ---------------------------------------------------------------------------
def build_normalized_adjacency(edge_index, num_nodes):
    """Dense A_hat = D^{-1/2} (A + I) D^{-1/2} from a (2, E) edge_index."""
    src, dst = edge_index[0], edge_index[1]
    adj = jnp.zeros((num_nodes, num_nodes), dtype=jnp.float32)
    adj = adj.at[src, dst].set(1.0)
    adj = adj.at[dst, src].set(1.0)                                   # undirected
    adj = jnp.maximum(adj, jnp.eye(num_nodes, dtype=jnp.float32))     # self loops (no double count)
    deg = jnp.sum(adj, axis=1)
    d_inv_sqrt = 1.0 / jnp.sqrt(jnp.maximum(deg, 1e-12))
    return adj * d_inv_sqrt[:, None] * d_inv_sqrt[None, :]


def init_params(key, in_channels, out_channels, heads=1):
    """Deterministic Glorot-style init for the two GNN layers."""
    k1, k2 = jax.random.split(key)
    hidden = out_channels * heads

    def glorot(k, fan_in, fan_out):
        limit = jnp.sqrt(6.0 / (fan_in + fan_out))
        return jax.random.uniform(k, (fan_in, fan_out), jnp.float32, -limit, limit)

    w1 = glorot(k1, in_channels, hidden)
    b1 = jnp.zeros((hidden,), jnp.float32)
    w2 = glorot(k2, hidden, out_channels)
    b2 = jnp.zeros((out_channels,), jnp.float32)
    return {"w1": w1, "b1": b1, "w2": w2, "b2": b2}


def gnn_forward(params, x, edge_index, drop_rate: float = 0.0,
                *, compute_dtype=jnp.bfloat16):
    """Pallas implementation of GNN.forward (GCN backbone, drop_rate=0)."""
    del drop_rate  # no-op at 0
    n, f_in = x.shape
    hidden = params["w1"].shape[1]
    out_ch = params["w2"].shape[1]

    # Pad node count and all feature dims to lane-dense multiples of 128.
    n_p = _round_up(n, 128)
    fin_p = _round_up(f_in, 128)
    hid_p = _round_up(hidden, 128)
    out_p = _round_up(out_ch, 128)

    a_hat = build_normalized_adjacency(edge_index, n)

    a_p = _pad2d(a_hat, n_p, n_p).astype(compute_dtype)         # mem-bound stream -> bf16
    x_p = _pad2d(x, n_p, fin_p).astype(compute_dtype)
    w1_p = _pad2d(params["w1"], fin_p, hid_p).astype(compute_dtype)
    w2_p = _pad2d(params["w2"], hid_p, out_p).astype(compute_dtype)
    b1_p = jnp.pad(params["b1"], (0, hid_p - hidden)).reshape(1, hid_p).astype(jnp.float32)
    b2_p = jnp.pad(params["b2"], (0, out_p - out_ch)).reshape(1, out_p).astype(jnp.float32)

    # Layer 1: relu(A_hat @ (X @ W1) + b1)  -- X@W1 hoisted out of the A-tile loop.
    xw1 = feature_transform(x_p, w1_p, out_dtype=compute_dtype)
    h = aggregate(a_p, xw1, b1_p, apply_relu=True, out_dtype=compute_dtype)

    # Layer 2: A_hat @ (h @ W2) + b2
    xw2 = feature_transform(h, w2_p, out_dtype=compute_dtype)
    y_p = aggregate(a_p, xw2, b2_p, apply_relu=False, out_dtype=jnp.float32)

    return y_p[:n, :out_ch]


# ---------------------------------------------------------------------------
if __name__ == "__main__":
    key = jax.random.PRNGKey(0)
    k_x, k_e, k_p = jax.random.split(key, 3)

    # Small graph: 32 nodes, 16 input features, 8 output classes, heads=1.
    num_nodes = 32
    in_channels = 16
    out_channels = 8
    num_edges = 64

    x = jax.random.normal(k_x, (num_nodes, in_channels), dtype=jnp.float32)
    edge_index = jax.random.randint(k_e, (2, num_edges), 0, num_nodes, dtype=jnp.int32)

    params = init_params(k_p, in_channels, out_channels, heads=1)

    out = gnn_forward(params, x, edge_index, drop_rate=0.0)
    out = jax.block_until_ready(out)

    # Pure-JAX reference with matching bf16 MXU inputs / f32 accumulation.
    a_hat = build_normalized_adjacency(edge_index, num_nodes)
    dt = jnp.bfloat16

    def mm(a, b):
        return jnp.dot(a.astype(dt), b.astype(dt), preferred_element_type=jnp.float32)

    ref_h = jnp.maximum(mm(a_hat, mm(x, params["w1"])) + params["b1"], 0.0)
    ref_y = mm(a_hat, mm(ref_h, params["w2"])) + params["b2"]

    assert out.shape == (num_nodes, out_channels)
    assert jnp.allclose(out, ref_y, atol=2e-2, rtol=2e-2), float(
        jnp.max(jnp.abs(out - ref_y))
    )

    print("KERNEL_OK")
</pallas_src>

<mosaic_0001>
module attributes {stable_mosaic.version = 11 : i64} {
  func.func @_xw_kernel(%arg0: i32, %arg1: memref<128x128xbf16, #tpu.memory_space<vmem>>, %arg2: memref<128x128xbf16, #tpu.memory_space<vmem>>, %arg3: memref<128x128xbf16, #tpu.memory_space<vmem>>) attributes {dimension_semantics = [#tpu.dimension_semantics<parallel>], iteration_bounds = array<i64: 1>, scalar_prefetch = 0 : i64, scratch_operands = 0 : i64, tpu.core_type = #tpu.core_type<tc>, window_params = [{transform_indices = @transform_0, window_bounds = array<i64: 128, 128>}, {pipeline_mode = #tpu.pipeline_mode<synchronous>, transform_indices = @transform_1, window_bounds = array<i64: 128, 128>}, {transform_indices = @transform_2, window_bounds = array<i64: 128, 128>}]} {
    %c0 = arith.constant 0 : index
    %c0_0 = arith.constant 0 : index
    %0 = vector.load %arg1[%c0, %c0_0] : memref<128x128xbf16, #tpu.memory_space<vmem>>, vector<128x128xbf16>
    %c0_1 = arith.constant 0 : index
    %c0_2 = arith.constant 0 : index
    %1 = vector.load %arg2[%c0_1, %c0_2] : memref<128x128xbf16, #tpu.memory_space<vmem>>, vector<128x128xbf16>
    %cst = arith.constant dense<0.000000e+00> : vector<128x128xf32>
    %2 = tpu.matmul %0, %1, %cst {dimension_numbers = #tpu.dot_dimension_numbers<[1], [0], [0], [1], [0, 0, 1, 1], [], []>} : vector<128x128xbf16>, vector<128x128xbf16>, vector<128x128xf32> -> vector<128x128xf32>
    %3 = arith.truncf %2 : vector<128x128xf32> to vector<128x128xbf16>
    %c0_3 = arith.constant 0 : index
    %c0_4 = arith.constant 0 : index
    %4 = vector.load %arg3[%c0_3, %c0_4] : memref<128x128xbf16, #tpu.memory_space<vmem>>, vector<128x128xbf16>
    tpu.vector_store %arg3[%c0_3, %c0_4], %3 {strides = array<i32>} : memref<128x128xbf16, #tpu.memory_space<vmem>>, vector<128x128xbf16>,
    return
  }
  func.func @transform_0(%arg0: i32) -> (i32, i32) {
    %c0_i32 = arith.constant 0 : i32
    %c0_i32_0 = arith.constant 0 : i32
    return %arg0, %c0_i32 : i32, i32
  }
  func.func @transform_1(%arg0: i32) -> (i32, i32) {
    %c0_i32 = arith.constant 0 : i32
    %c0_i32_0 = arith.constant 0 : i32
    %c0_i32_1 = arith.constant 0 : i32
    return %c0_i32, %c0_i32_0 : i32, i32
  }
  func.func @transform_2(%arg0: i32) -> (i32, i32) {
    %c0_i32 = arith.constant 0 : i32
    %c0_i32_0 = arith.constant 0 : i32
    return %arg0, %c0_i32 : i32, i32
  }
}

</mosaic_0001>

<bundles_post_ra>
// kernel: tpu_custom_call.1
= control target key start
LH: loop header
LB: loop body
LE: loop exit
PB: predicated region body
PF: predicated region fallthrough
CT: control target
= control target key end

     0   :  { %7 = vsyncpa [#allocation3], 0  ;;  %s545_s0 = inlined_call_operand.hbm [shape: bf16[128,128], index: 0, kind: input, shape index: {}]   ;;  %s546_s1 = inlined_call_operand.hbm [shape: bf16[128,128], index: 1, kind: input, shape index: {}]   ;;  %s547_s2 = inlined_call_operand.hbm [shape: bf16[128,128], index: 2, kind: output, shape index: {}]  }
   0x1   :  { %8 = vsyncpa [#allocation6], 0 }
   0x2   :  { %9 = vsyncpa [#allocation4], 0  ;;  %s14_s11 = sshll.u32 %s545_s0, 4  ;;  %s507_s12 = smov [#allocation2]   ;;  %s15_s11 = int_to_ptr.hbm [resolvable:$true] %s14_s11 }
   0x3   :  { %s16_s13 = sshll.u32 %s507_s12, 4  ;;  %s27_s16 = sshll.u32 %s546_s1, 4  ;;  %s17_s13 = int_to_ptr.vmem [resolvable:$true] %s16_s13  ;;  %s28_s16 = int_to_ptr.hbm [resolvable:$true] %s27_s16 }
   0x4   :  { %s508_s17 = smov 64   ;;  %s509_s18 = smov 4  }
   0x5   :  { %22 = dma.hbm_to_vmem [thread:$0]  %s15_s11, 1024, %s17_s13, [#allocation3], %s508_s17, %s508_s17, %s509_s18  }
   0x6   :  { %s510_s19 = smov [#allocation5]  }
   0x7   :  { %s29_s20 = sshll.u32 %s510_s19, 4  ;;  %s30_s20 = int_to_ptr.vmem [resolvable:$true] %s29_s20 }
   0x8   :  { %35 = dma.hbm_to_vmem [thread:$0]  %s28_s16, 1024, %s30_s20, [#allocation6], %s508_s17, %s508_s17, %s509_s18  }
   0x9   :  { %501 = dma.done.wait [#allocation3], 1024  }
   0xa   :  { %502 = vsyncadd [#allocation3], 4294966272 }
   0xb   :  { %503 = dma.done.wait [#allocation6], 1024  }
   0xc   :  { %504 = vsyncadd [#allocation6], 4294966272  ;;  %v352_v0 = vld [vmem:[#allocation5 + $0x38] sm:$0xff]  ;;  %v351_v1 = vld [vmem:[#allocation5 + $0x30] sm:$0xff]  ;;  %s511_s0 = smov [#allocation7]   ;;  %s259_s23 = sshll.u32 %s547_s2, 4  ;;  %s260_s23 = int_to_ptr.hbm [resolvable:$true] %s259_s23 }
   0xd   :  { %172 = vmatpush.bf16.msra.mxu0 %v352_v0  ;;  %400 = vmatpush.bf16.msra.mxu1 %v352_v0  ;;  %v350_v2 = vld [vmem:[#allocation5 + $0x28] sm:$0xff]  ;;  %v349_v3 = vld [vmem:[#allocation5 + $0x20] sm:$0xff]  ;;  %v348_v4 = vld [vmem:[#allocation5 + $0x18] sm:$0xff]  ;;  %s257_s1 = sshll.u32 %s511_s0, 4  ;;  %s258_s1 = int_to_ptr.vmem [resolvable:$true] %s257_s1 }
   0xe   :  { %401 = vmatpush.bf16.msra.mxu2 %v352_v0  ;;  %402 = vmatpush.bf16.msra.mxu3 %v352_v0  ;;  %v347_v5 = vld [vmem:[#allocation5 + $0x10] sm:$0xff]  ;;  %v346_v6 = vld [vmem:[#allocation5 + $0x8] sm:$0xff]  ;;  %v345_v7 = vld [vmem:[#allocation5] sm:$0xff] }
   0xf   :  { %v337_v8 = vld [vmem:[#allocation2] sm:$0xff]  ;;  %v339_v9 = vld [vmem:[#allocation2 + $0x10] sm:$0xff]  ;;  %v338_v12 = vld [vmem:[#allocation2 + $0x8] sm:$0xff] }
  0x10   :  { %v341_v10 = vld [vmem:[#allocation2 + $0x20] sm:$0xff]  ;;  %v343_v11 = vld [vmem:[#allocation2 + $0x30] sm:$0xff]  ;;  %v340_v13 = vld [vmem:[#allocation2 + $0x18] sm:$0xff] }
  0x11   :  { %173 = vmatpush.bf16.msra.mxu0 %v351_v1  ;;  %403 = vmatpush.bf16.msra.mxu1 %v351_v1  ;;  %v342_v14 = vld [vmem:[#allocation2 + $0x28] sm:$0xff]  ;;  %v344_v15 = vld [vmem:[#allocation2 + $0x38] sm:$0xff] }
  0x12   :  { %404 = vmatpush.bf16.msra.mxu2 %v351_v1  ;;  %405 = vmatpush.bf16.msra.mxu3 %v351_v1 }
  0x15   :  { %174 = vmatpush.bf16.msra.mxu0 %v350_v2  ;;  %406 = vmatpush.bf16.msra.mxu1 %v350_v2 }
  0x16   :  { %407 = vmatpush.bf16.msra.mxu2 %v350_v2  ;;  %408 = vmatpush.bf16.msra.mxu3 %v350_v2 }
  0x19   :  { %175 = vmatpush.bf16.msra.mxu0 %v349_v3  ;;  %409 = vmatpush.bf16.msra.mxu1 %v349_v3 }
  0x1a   :  { %410 = vmatpush.bf16.msra.mxu2 %v349_v3  ;;  %411 = vmatpush.bf16.msra.mxu3 %v349_v3 }
  0x1d   :  { %176 = vmatpush.bf16.msra.mxu0 %v348_v4  ;;  %412 = vmatpush.bf16.msra.mxu1 %v348_v4 }
  0x1e   :  { %413 = vmatpush.bf16.msra.mxu2 %v348_v4  ;;  %414 = vmatpush.bf16.msra.mxu3 %v348_v4 }
  0x21   :  { %177 = vmatpush.bf16.msra.mxu0 %v347_v5  ;;  %415 = vmatpush.bf16.msra.mxu1 %v347_v5 }
  0x22   :  { %416 = vmatpush.bf16.msra.mxu2 %v347_v5  ;;  %417 = vmatpush.bf16.msra.mxu3 %v347_v5 }
  0x25   :  { %178 = vmatpush.bf16.msra.mxu0 %v346_v6  ;;  %418 = vmatpush.bf16.msra.mxu1 %v346_v6 }
  0x26   :  { %419 = vmatpush.bf16.msra.mxu2 %v346_v6  ;;  %420 = vmatpush.bf16.msra.mxu3 %v346_v6 }
  0x29   :  { %179 = vmatpush.bf16.msra.mxu0 %v345_v7  ;;  %421 = vmatpush.bf16.msra.mxu1 %v345_v7 }
  0x2a   :  { %422 = vmatpush.bf16.msra.mxu2 %v345_v7  ;;  %423 = vmatpush.bf16.msra.mxu3 %v345_v7 }
  0x2c   :  { %180 = vmatmul.bf16.vlgmr.msra.gmra.mxu0 %v337_v8  ;;  %190 = vmatmul.bf16.vlgmr.msra.gmra.mxu1 %v339_v9 }
  0x2d   :  { %200 = vmatmul.bf16.vlgmr.msra.gmra.mxu2 %v341_v10  ;;  %210 = vmatmul.bf16.vlgmr.msra.gmra.mxu3 %v343_v11 }
  0x3c   :  { %185 = vmatmul.bf16.gmra.mxu0 %v338_v12  ;;  %195 = vmatmul.bf16.gmra.mxu1 %v340_v13 }
  0x3d   :  { %205 = vmatmul.bf16.gmra.mxu2 %v342_v14  ;;  %215 = vmatmul.bf16.gmra.mxu3 %v344_v15 }
  0xa9   :  { %v181_v16 = vpop.f32.mrf.mxu0  ;;  %v191_v17 = vpop.f32.mrf.mxu1 }
  0xb0   :  { %v201_v18 = vpop.f32.mrf.mxu2  ;;  %v211_v19 = vpop.f32.mrf.mxu3 }
  0xb1   :  { %v183_v20 = vpop.f32.mrf.mxu0  ;;  %v193_v21 = vpop.f32.mrf.mxu1 }
  0xb2   :  { %v356_v22 = vpack.c.bf16 %v183_v20, %v181_v16  ;;  %v366_v23 = vpack.c.bf16 %v193_v21, %v191_v17 }
  0xb4   :  { %357 = vst [vmem:[#allocation7] sm:$0xff] %v356_v22  }
  0xb5   :  { %394 = vst [vmem:[#allocation7 + $0x10] sm:$0xff] %v366_v23  }
  0xb8   :  { %v203_v24 = vpop.f32.mrf.mxu2  ;;  %v213_v25 = vpop.f32.mrf.mxu3 }
  0xb9   :  { %v376_v26 = vpack.c.bf16 %v203_v24, %v201_v18  ;;  %v386_v27 = vpack.c.bf16 %v213_v25, %v211_v19  ;;  %v186_v28 = vpop.f32.mrf.mxu0  ;;  %v196_v29 = vpop.f32.mrf.mxu1 }
  0xbb   :  { %396 = vst [vmem:[#allocation7 + $0x20] sm:$0xff] %v376_v26  }
  0xbc   :  { %398 = vst [vmem:[#allocation7 + $0x30] sm:$0xff] %v386_v27  }
  0xc0   :  { %v206_v30 = vpop.f32.mrf.mxu2  ;;  %v216_v31 = vpop.f32.mrf.mxu3 }
  0xc1   :  { %v188_v32 = vpop.f32.mrf.mxu0  ;;  %v198_v33 = vpop.f32.mrf.mxu1 }
  0xc2   :  { %v361_v34 = vpack.c.bf16 %v188_v32, %v186_v28  ;;  %v371_v35 = vpack.c.bf16 %v198_v33, %v196_v29 }
  0xc4   :  { %393 = vst [vmem:[#allocation7 + $0x8] sm:$0xff] %v361_v34  }
  0xc5   :  { %395 = vst [vmem:[#allocation7 + $0x18] sm:$0xff] %v371_v35  }
  0xc8   :  { %v208_v36 = vpop.f32.mrf.mxu2  ;;  %v218_v37 = vpop.f32.mrf.mxu3 }
  0xc9   :  { %v381_v38 = vpack.c.bf16 %v208_v36, %v206_v30  ;;  %v391_v39 = vpack.c.bf16 %v218_v37, %v216_v31 }
  0xcb   :  { %397 = vst [vmem:[#allocation7 + $0x28] sm:$0xff] %v381_v38  }
  0xcc   :  { %399 = vst [vmem:[#allocation7 + $0x38] sm:$0xff] %v391_v39  }
  0xcd   :  { %265 = dma.vmem_to_hbm [thread:$0]  %s258_s1, 1024, %s260_s23, [#allocation4], %s508_s17, %s508_s17, %s509_s18  }
  0xce   :  { %505 = dma.done.wait [#allocation4], 1024  }
  0xcf   :  { %506 = vsyncadd [#allocation4], 4294966272 }
  0xd0   :  { %270 = vsyncpa [#allocation3], 1 }
  0xd1   :  { %271 = vsyncpa [#allocation6], 1 }
  0xd2   :  { %272 = vsyncpa [#allocation4], 1 }

</bundles_post_ra>
